<compile_context>
chip_gen: v7x
topology: tpu7x:2x2x1
jax: 0.10.0
libtpu: 0.0.40
codegen_flags: <defaults>
</compile_context>

<pallas_src>
import jax
import jax.numpy as jnp
from jax.experimental import pallas as pl
from jax.experimental.pallas import tpu as pltpu


def _chip_budgets():
    """Per-generation VMEM budgets.

    Returns (per_input_buffer_bytes, vmem_limit_bytes, likely_multi_core).
    """
    cap = None
    try:
        info = pltpu.get_tpu_info()
        cap = getattr(info, "vmem_capacity_bytes", None)
    except Exception:
        cap = None
    if not cap:
        cap = 128 << 20  # conservative default: v5e/v6e-class chip
    if cap >= (96 << 20):
        # v5e / v6e: 128 MiB physical VMEM, single TensorCore per chip.
        return 16 << 20, 48 << 20, False
    # v7x: 64 MiB per TensorCore, 2 TensorCores per chip.
    return 12 << 20, 44 << 20, True


def _make_avg_pool_kernel(S: int, TS: int, ragged_s: bool):
    inv_s = 1.0 / float(S)  # fold normalization into a single finalize multiply

    def kernel(x_ref, o_ref, acc_ref):
        s_idx = pl.program_id(2)
        last = pl.num_programs(2) - 1

        @pl.when(s_idx == 0)
        def _init():
            acc_ref[...] = jnp.zeros_like(acc_ref)

        if ragged_s:
            # Hot path: plain accumulate on every full seq tile.
            @pl.when(s_idx != last)
            def _accumulate():
                acc_ref[...] += jnp.sum(x_ref[...], axis=1, dtype=jnp.float32)

            # Cold path: mask rows past the true sequence length (last tile only).
            @pl.when(s_idx == last)
            def _accumulate_masked():
                x = x_ref[...]  # (TB, TS, TH)
                row = jax.lax.broadcasted_iota(jnp.int32, (TS, 1), 0) + s_idx * TS
                x = jnp.where(row < S, x, jnp.zeros((), dtype=x.dtype))
                acc_ref[...] += jnp.sum(x, axis=1, dtype=jnp.float32)
        else:
            acc_ref[...] += jnp.sum(x_ref[...], axis=1, dtype=jnp.float32)

        @pl.when(s_idx == last)
        def _finalize():
            o_ref[...] = (acc_ref[...] * inv_s).astype(o_ref.dtype)

    return kernel


def avg_pooler(hidden_states: jax.Array,
               *,
               seq_tile: int | None = None,
               batch_tile: int | None = None,
               hidden_tile: int | None = None,
               vmem_limit_bytes: int | None = None) -> jax.Array:
    """AdaptiveAvgPool2d((1, H)) + view(-1, H) for (B, S, H) inputs."""
    assert hidden_states.ndim == 3, "expect (batch, seq, hidden)"
    B, S, H = hidden_states.shape
    dtype = hidden_states.dtype
    itemsize = jnp.dtype(dtype).itemsize
    # Sublane packing: 8 rows for 32-bit, 16 for bf16, 32 for int8/fp8.
    pack = max(8, 32 // itemsize)

    per_buf_budget, auto_limit, multi_core = _chip_budgets()
    if vmem_limit_bytes is None:
        vmem_limit_bytes = auto_limit

    # --- batch tile: keep the (TB, TH) output block 8-aligned or full-extent.
    if batch_tile is None:
        TB = min(B, 8)
    else:
        TB = min(B, batch_tile)
        if TB < B and TB % 8 != 0:
            TB = max(8, (TB // 8) * 8)
        TB = min(B, TB)
    n_batch_tiles = pl.cdiv(B, TB)

    # --- hidden tile: full H by default; split evenly into >=2 multiples of 128
    #     only on 2-TC chips when there's a single parallel batch tile.
    if hidden_tile is not None:
        TH = min(H, hidden_tile)
        if TH < H and TH % 128 != 0:
            TH = H  # keep the lane dim 128-aligned or full-extent
    else:
        TH = H
        if multi_core and n_batch_tiles < 2 and H % 128 == 0 and H >= 256:
            k = H // 128
            for m in range(k // 2, 0, -1):
                if k % m == 0:       # even split, no ragged hidden tiles
                    TH = 128 * m
                    break

    # --- seq tile: as large as the per-buffer byte budget allows (no row cap).
    if seq_tile is None:
        ts = per_buf_budget // max(1, TB * TH * itemsize)
        ts = max(pack, (ts // pack) * pack)
        TS = min(S, ts)
    else:
        TS = min(S, seq_tile)
    if TS < S and TS % pack != 0:
        # Round a misaligned tile down; never fall back to the full sequence.
        TS = max(pack, (TS // pack) * pack)
        TS = min(S, TS)

    grid = (n_batch_tiles, pl.cdiv(H, TH), pl.cdiv(S, TS))
    ragged_s = (S % TS) != 0

    kernel = _make_avg_pool_kernel(S, TS, ragged_s)

    cost = pl.CostEstimate(
        flops=B * S * H,
        transcendentals=0,
        bytes_accessed=B * S * H * itemsize + B * H * itemsize,
    )

    return pl.pallas_call(
        kernel,
        out_shape=jax.ShapeDtypeStruct((B, H), dtype),
        grid_spec=pltpu.PrefetchScalarGridSpec(
            num_scalar_prefetch=0,
            grid=grid,
            in_specs=[pl.BlockSpec((TB, TS, TH), lambda b, h, s: (b, s, h))],
            out_specs=pl.BlockSpec((TB, TH), lambda b, h, s: (b, h)),
            scratch_shapes=[pltpu.VMEM((TB, TH), jnp.float32)],
        ),
        compiler_params=pltpu.CompilerParams(
            dimension_semantics=("parallel", "parallel", "arbitrary"),
            vmem_limit_bytes=vmem_limit_bytes,
        ),
        cost_estimate=cost,
    )(hidden_states)


if __name__ == "__main__":
    key = jax.random.PRNGKey(0)

    # Small shape matching the module's forward: (batch, seq, hidden),
    # config.hidden_size = 32.
    batch, seq, hidden = 2, 8, 32
    hidden_states = jax.random.normal(key, (batch, seq, hidden), dtype=jnp.float32)

    out = jax.block_until_ready(avg_pooler(hidden_states))
    ref = jnp.mean(hidden_states, axis=1)
    assert out.shape == (batch, hidden)
    assert jnp.allclose(out, ref, atol=1e-5, rtol=1e-5), "mismatch vs reference"

    # Exercise the tiled / ragged-seq accumulation path.
    k2 = jax.random.PRNGKey(1)
    b2, s2, h2 = 4, 136, 128
    x2 = jax.random.normal(k2, (b2, s2, h2), dtype=jnp.float32)
    out2 = jax.block_until_ready(avg_pooler(x2, seq_tile=64))
    ref2 = jnp.mean(x2, axis=1)
    assert out2.shape == (b2, h2)
    assert jnp.allclose(out2, ref2, atol=1e-5, rtol=1e-5), "mismatch (tiled path)"

    # Exercise the hidden-split path (auto-enabled only on 2-TC chips;
    # forced here via hidden_tile for coverage on any generation).
    k3 = jax.random.PRNGKey(2)
    b3, s3, h3 = 2, 48, 256
    x3 = jax.random.normal(k3, (b3, s3, h3), dtype=jnp.float32)
    out3 = jax.block_until_ready(avg_pooler(x3, hidden_tile=128, seq_tile=16))
    ref3 = jnp.mean(x3, axis=1)
    assert out3.shape == (b3, h3)
    assert jnp.allclose(out3, ref3, atol=1e-5, rtol=1e-5), "mismatch (hidden-split path)"

    print("KERNEL_OK")
</pallas_src>

<mosaic_0001>
module attributes {stable_mosaic.version = 11 : i64} {
  func.func @kernel(%arg0: i32, %arg1: i32, %arg2: i32, %arg3: memref<2x8x32xf32, #tpu.memory_space<vmem>>, %arg4: memref<2x32xf32, #tpu.memory_space<vmem>>, %arg5: memref<2x32xf32, #tpu.memory_space<vmem>>) attributes {dimension_semantics = [#tpu.dimension_semantics<parallel>, #tpu.dimension_semantics<parallel>, #tpu.dimension_semantics<arbitrary>], iteration_bounds = array<i64: 1, 1, 1>, scalar_prefetch = 0 : i64, scratch_operands = 1 : i64, tpu.core_type = #tpu.core_type<tc>, window_params = [{transform_indices = @transform_0, window_bounds = array<i64: 2, 8, 32>}, {transform_indices = @transform_1, window_bounds = array<i64: 2, 32>}]} {
    %c0_i32 = arith.constant 0 : i32
    %0 = arith.cmpi eq, %arg2, %c0_i32 : i32
    %1 = arith.extui %0 : i1 to i32
    %c0_i32_0 = arith.constant 0 : i32
    %2 = arith.cmpi ne, %1, %c0_i32_0 : i32
    scf.if %2 {
      %cst_9 = arith.constant 0.000000e+00 : f32
      %11 = vector.broadcast %cst_9 : f32 to vector<2x32xf32>
      %c0_10 = arith.constant 0 : index
      %c0_11 = arith.constant 0 : index
      %12 = vector.load %arg5[%c0_10, %c0_11] : memref<2x32xf32, #tpu.memory_space<vmem>>, vector<2x32xf32>
      tpu.vector_store %arg5[%c0_10, %c0_11], %11 {strides = array<i32>} : memref<2x32xf32, #tpu.memory_space<vmem>>, vector<2x32xf32>,
    } else {
    }
    %c0 = arith.constant 0 : index
    %c0_1 = arith.constant 0 : index
    %3 = vector.load %arg5[%c0, %c0_1] : memref<2x32xf32, #tpu.memory_space<vmem>>, vector<2x32xf32>
    %c0_2 = arith.constant 0 : index
    %c0_3 = arith.constant 0 : index
    %c0_4 = arith.constant 0 : index
    %4 = vector.load %arg3[%c0_2, %c0_3, %c0_4] : memref<2x8x32xf32, #tpu.memory_space<vmem>>, vector<2x8x32xf32>
    %cst = arith.constant dense<0.000000e+00> : vector<2x32xf32>
    %5 = vector.multi_reduction <add>, %4, %cst [1] : vector<2x8x32xf32> to vector<2x32xf32>
    %6 = arith.addf %3, %5 : vector<2x32xf32>
    %c0_5 = arith.constant 0 : index
    %c0_6 = arith.constant 0 : index
    %7 = vector.load %arg5[%c0_5, %c0_6] : memref<2x32xf32, #tpu.memory_space<vmem>>, vector<2x32xf32>
    tpu.vector_store %arg5[%c0_5, %c0_6], %6 {strides = array<i32>} : memref<2x32xf32, #tpu.memory_space<vmem>>, vector<2x32xf32>,
    %c0_i32_7 = arith.constant 0 : i32
    %8 = arith.cmpi eq, %arg2, %c0_i32_7 : i32
    %9 = arith.extui %8 : i1 to i32
    %c0_i32_8 = arith.constant 0 : i32
    %10 = arith.cmpi ne, %9, %c0_i32_8 : i32
    scf.if %10 {
      %c0_9 = arith.constant 0 : index
      %c0_10 = arith.constant 0 : index
      %11 = vector.load %arg5[%c0_9, %c0_10] : memref<2x32xf32, #tpu.memory_space<vmem>>, vector<2x32xf32>
      %cst_11 = arith.constant 1.250000e-01 : f32
      %12 = vector.broadcast %cst_11 : f32 to vector<2x32xf32>
      %13 = arith.mulf %11, %12 : vector<2x32xf32>
      %c0_12 = arith.constant 0 : index
      %c0_13 = arith.constant 0 : index
      %14 = vector.load %arg4[%c0_12, %c0_13] : memref<2x32xf32, #tpu.memory_space<vmem>>, vector<2x32xf32>
      tpu.vector_store %arg4[%c0_12, %c0_13], %13 {strides = array<i32>} : memref<2x32xf32, #tpu.memory_space<vmem>>, vector<2x32xf32>,
    } else {
    }
    return
  }
  func.func @transform_0(%arg0: i32, %arg1: i32, %arg2: i32) -> (i32, i32, i32) {
    %c0_i32 = arith.constant 0 : i32
    return %arg0, %arg2, %arg1 : i32, i32, i32
  }
  func.func @transform_1(%arg0: i32, %arg1: i32, %arg2: i32) -> (i32, i32) {
    %c0_i32 = arith.constant 0 : i32
    return %arg0, %arg1 : i32, i32
  }
}

</mosaic_0001>

<bundles_post_ra>
// kernel: tpu_custom_call.1
= control target key start
LH: loop header
LB: loop body
LE: loop exit
PB: predicated region body
PF: predicated region fallthrough
CT: control target
= control target key end

     0   :  { %6 = vsyncpa [#allocation4], 0  ;;  %s171_s0 = inlined_call_operand.hbm [shape: f32[2,8,32], index: 0, kind: input, shape index: {}]   ;;  %s172_s1 = inlined_call_operand.hbm [shape: f32[2,32], index: 1, kind: output, shape index: {}]  }
   0x1   :  { %7 = vsyncpa [#allocation5], 0  ;;  %s129_s6 = smov [#allocation3]   ;;  %s81_s10 = scalar_lea.hbm %s171_s0, 256 }
   0x2   :  { %s13_s7 = sshll.u32 %s129_s6, 4  ;;  %p82_p0 = scmp.ne.s32.totalorder %s171_s0, %s81_s10  ;;  %s14_s7 = int_to_ptr.vmem [resolvable:$true] %s13_s7 }
   0x3   :  { %p85_p1 = scmp.lt.u32.totalorder %s81_s10, %s171_s0 }
   0x5   :  { %p87_p2 = pnand %p85_p1, %p82_p0 }
   0x7   :  { %90 = shalt.err (!%p87_p2)
}
   0x8   :  { %s91_s15 = scalar_lea.vmem %s14_s7, 256  ;;  %p96_p4 = scmp.lt.s32.totalorder %s14_s7, %s14_s7 }
   0x9   :  { %p92_p3 = scmp.ne.s32.totalorder %s14_s7, %s91_s15  ;;  %p97_p5 = scmp.lt.s32.totalorder %s91_s15, %s91_s15 }
   0xb   :  { %p98_p6 = por %p97_p5, %p96_p4 }
   0xd   :  { %p99_p7 = pnand %p98_p6, %p92_p3 }
   0xf   :  { %102 = shalt.err (!%p99_p7)
}
  0x10   :  { %s130_s16 = smov 128   ;;  %s131_s17 = smov 8  }
  0x11   :  { %19 = dma.hbm_to_vmem [thread:$0]  %s171_s0, 256, %s14_s7, [#allocation4], %s130_s16, %s130_s16, %s131_s17  }
  0x12   :  { %125 = dma.done.wait [#allocation4], 256  }
  0x13   :  { %126 = vsyncadd [#allocation4], 4294967040  ;;  %vm27_vm0 = vcmask 254976   ;;  %v132_v0 = vmov 0.0   ;;  %vm32_vm1 = vcmask 261120   ;;  %v30_v1 = vld [vmem:[#allocation3] sm:$0xff] }
  0x14   :  { %28 = vst.msk [vmem:[#allocation2] sm:$0x3] %vm27_vm0, %v132_v0  ;;  %v31_v2 = vld [vmem:[#allocation3 + $0x8] sm:$0xff]  ;;  %v33_v3 = vsel %vm32_vm1, %v30_v1, 0.0  ;;  %vm49_vm2 = vcmask 1041409   ;;  %s133_s0 = smov [#allocation6]  }
  0x15   :  { %v40_v4 = vsel %vm32_vm1, %v31_v2, 0.0  ;;  %v34_v5 = vrot.slane %v33_v3, 4  ;;  %s67_s20 = sshll.u32 %s133_s0, 4  ;;  %s68_s20 = int_to_ptr.vmem [resolvable:$true] %s67_s20 }
  0x16   :  { %v41_v6 = vrot.slane %v40_v4, 4  ;;  %s103_s21 = scalar_lea.vmem %s68_s20, 32  ;;  %p108_p9 = scmp.lt.s32.totalorder %s68_s20, %s68_s20 }
  0x17   :  { %v35_v7 = vadd.f32 %v34_v5, %v33_v3  ;;  %p104_p8 = scmp.ne.s32.totalorder %s68_s20, %s103_s21  ;;  %p109_p10 = scmp.lt.s32.totalorder %s103_s21, %s103_s21 }
  0x18   :  { %v42_v8 = vadd.f32 %v41_v6, %v40_v4 }
  0x19   :  { %v36_v9 = vrot.slane %v35_v7, 2  ;;  %p110_p11 = por %p109_p10, %p108_p9 }
  0x1a   :  { %v43_v10 = vrot.slane %v42_v8, 2 }
  0x1b   :  { %v37_v11 = vadd.f32 %v36_v9, %v35_v7  ;;  %v29_v15 = vld [vmem:[#allocation2] sm:$0x3]  ;;  %p111_p12 = pnand %p110_p11, %p104_p8 }
  0x1c   :  { %v44_v12 = vadd.f32 %v43_v10, %v42_v8 }
  0x1d   :  { %v38_v13 = vrot.slane %v37_v11, 1 }
  0x1e   :  { %v45_v14 = vrot.slane %v44_v12, 1 }
  0x1f   :  { %v39_v16 = vadd.f32 %v38_v13, %v37_v11 }
  0x20   :  { %v46_v17 = vadd.f32 %v45_v14, %v44_v12 }
  0x22   :  { %v50_v18 = vsel %vm49_vm2, %v46_v17, %v39_v16 }
  0x23   :  { %v52_v19 = vadd.f32 %v50_v18, %v29_v15 }
  0x25   :  { %54 = vst.msk [vmem:[#allocation2] sm:$0x3] %vm27_vm0, %v52_v19 }
  0x2c   :  { %v58_v20 = vld [vmem:[#allocation2] sm:$0x3] }
  0x2d   :  { %v59_v21 = vmul.f32 0.125, %v58_v20 }
  0x2f   :  { %60 = vst.msk [vmem:[#allocation6] sm:$0x3] %vm27_vm0, %v59_v21 }
  0x30   :  { %114 = shalt.err (!%p111_p12)
}
  0x31   :  { %s115_s24 = scalar_lea.hbm %s172_s1, 32 }
  0x32   :  { %p116_p13 = scmp.ne.s32.totalorder %s172_s1, %s115_s24  ;;  %p119_p0 = scmp.lt.u32.totalorder %s115_s24, %s172_s1 }
  0x34   :  { %p121_p1 = pnand %p119_p0, %p116_p13 }
  0x36   :  { %124 = shalt.err (!%p121_p1)
}
  0x37   :  { %70 = dma.vmem_to_hbm [thread:$0]  %s68_s20, 32, %s172_s1, [#allocation5]  }
  0x38   :  { %127 = dma.done.wait [#allocation5], 32  }
  0x39   :  { %128 = vsyncadd [#allocation5], 4294967264 }
  0x3a   :  { %74 = vsyncpa [#allocation4], 1 }
  0x3b   :  { %75 = vsyncpa [#allocation5], 1 }

</bundles_post_ra>
